<compile_context>
chip_gen: v7x
topology: tpu7x:2x2x1
jax: 0.10.0
libtpu: 0.0.40
codegen_flags: <defaults>
</compile_context>

<pallas_src>
import functools
import math

import numpy as np
import jax
import jax.numpy as jnp
from jax import lax
from jax.experimental import pallas as pl
from jax.experimental.pallas import tpu as pltpu


# ----------------------------- helpers --------------------------------------

def _dot(a, b):
    return jnp.dot(a, b, preferred_element_type=jnp.float32)


def _q_kt(a, b):
    # a @ b.T without an explicit in-kernel transpose (contract last dims).
    return lax.dot_general(a, b, (((1,), (1,)), ((), ())),
                           preferred_element_type=jnp.float32)


def _softmax_rows(s):
    # Softmax over the key axis (standard attention semantics).
    # TODO(synk): mirrors the accepted previous implementation (key-axis softmax).
    s = s - jnp.max(s, axis=-1, keepdims=True)
    p = jnp.exp(s)
    return p * pl.reciprocal(jnp.sum(p, axis=-1, keepdims=True), approx=True)


# ----------------------------- Pallas kernels -------------------------------

def _gcn_stack_kernel(adj_ref, x_ref, w1_ref, b1_ref, w2_ref, b2_ref,
                      w3_ref, b3_ref, o_ref):
    """3x GCNConv+ReLU with the concatenated [h1|h2|h3] output written lane-dense."""
    adj = adj_ref[...]

    def gcn(h, w_ref, b_ref):
        return jnp.maximum(_dot(adj, _dot(h, w_ref[...])) + b_ref[...], 0.0)

    h1 = gcn(x_ref[...], w1_ref, b1_ref)
    h2 = gcn(h1, w2_ref, b2_ref)
    h3 = gcn(h2, w3_ref, b3_ref)
    o_ref[...] = jnp.concatenate([h1, h2, h3], axis=1)


def _pma_gcn_kernel(s_ref, x_ref, adj_ref, scat_ref, mask_ref,
                    wq_ref, bq_ref, wkv_ref, bkv_ref, wo_ref, bo_ref, o_ref,
                    *, B, Sq, Nmax, num_heads, dim_V):
    """GMPool_G: PMA with GCN-projected K/V, masked multi-head attention, residual fc_o.

    All batches and heads handled inside one grid point (B and H are tiny Python
    loops, unrolled at trace time -> no per-step pipeline overhead, no HBM
    round-trips for intermediates).
    """
    d = dim_V
    dh = d // num_heads
    scale = 1.0 / math.sqrt(d)

    # Seeds are identical across batch, so fc_q is computed once.
    q = _dot(s_ref[...], wq_ref[...]) + bq_ref[...]                    # [Sq, d]

    # Fused K|V GCN projection on node features: A_norm @ (X @ [Wk|Wv]) + [bk|bv].
    kv_nodes = _dot(adj_ref[...], _dot(x_ref[...], wkv_ref[...])) + bkv_ref[...]  # [Ntot, 2d]

    # to_dense_batch as a single one-hot scatter matmul (padding rows -> zeros,
    # matching torch_geometric.to_dense_batch).
    kv = _dot(scat_ref[...], kv_nodes)                                  # [B*Nmax, 2d]

    mask = mask_ref[...]                                                # [B, Nmax] additive
    outs = []
    for b in range(B):
        kvb = kv[b * Nmax:(b + 1) * Nmax, :]
        kb, vb = kvb[:, :d], kvb[:, d:]
        mb = mask[b:b + 1, :]                                           # [1, Nmax]
        heads = []
        for h in range(num_heads):
            sl = slice(h * dh, (h + 1) * dh)
            qh, kh, vh = q[:, sl], kb[:, sl], vb[:, sl]
            sc = _q_kt(qh, kh) * scale + mb                             # [Sq, Nmax]
            p = _softmax_rows(sc)
            heads.append(qh + _dot(p, vh))                              # residual Q_ + A V_
        outs.append(jnp.concatenate(heads, axis=1))                     # [Sq, d]
    o = jnp.concatenate(outs, axis=0)                                   # [B*Sq, d]
    # O = O + relu(fc_o(O))   (ln=False -> no LayerNorm)
    o_ref[...] = o + jnp.maximum(_dot(o, wo_ref[...]) + bo_ref[...], 0.0)


def _mab_linear_kernel(qin_ref, kin_ref, wq_ref, bq_ref, wkv_ref, bkv_ref,
                       wo_ref, bo_ref, o_ref, *, B, Sq, Nk, num_heads, dim_V):
    """MAB with Linear K/V (SelfAtt / GMPool_I). No mask (mask is None after 1st pool)."""
    d = dim_V
    dh = d // num_heads
    scale = 1.0 / math.sqrt(d)

    q = _dot(qin_ref[...], wq_ref[...]) + bq_ref[...]                   # [B*Sq, d]
    kv = _dot(kin_ref[...], wkv_ref[...]) + bkv_ref[...]                # [B*Nk, 2d]

    outs = []
    for b in range(B):
        qb = q[b * Sq:(b + 1) * Sq, :]
        kvb = kv[b * Nk:(b + 1) * Nk, :]
        kb, vb = kvb[:, :d], kvb[:, d:]
        heads = []
        for h in range(num_heads):
            sl = slice(h * dh, (h + 1) * dh)
            qh, kh, vh = qb[:, sl], kb[:, sl], vb[:, sl]
            sc = _q_kt(qh, kh) * scale                                  # [Sq, Nk]
            p = _softmax_rows(sc)
            heads.append(qh + _dot(p, vh))
        outs.append(jnp.concatenate(heads, axis=1))
    o = jnp.concatenate(outs, axis=0)                                   # [B*Sq, d]
    o_ref[...] = o + jnp.maximum(_dot(o, wo_ref[...]) + bo_ref[...], 0.0)


def _classifier_kernel(x_ref, w1_ref, b1_ref, w2_ref, b2_ref, w3_ref, b3_ref, o_ref):
    """Linear-ReLU-Linear-ReLU-Linear + log_softmax (dropout = identity at eval)."""
    h = jnp.maximum(_dot(x_ref[...], w1_ref[...]) + b1_ref[...], 0.0)
    h = jnp.maximum(_dot(h, w2_ref[...]) + b2_ref[...], 0.0)
    y = _dot(h, w3_ref[...]) + b3_ref[...]
    y = y - jnp.max(y, axis=-1, keepdims=True)
    o_ref[...] = y - jnp.log(jnp.sum(jnp.exp(y), axis=-1, keepdims=True))


# ----------------------------- wrappers --------------------------------------

def gcn_stack(adj, x, conv_params):
    (w1, b1), (w2, b2), (w3, b3) = conv_params
    Ntot = x.shape[0]
    d_out = w1.shape[1] + w2.shape[1] + w3.shape[1]
    return pl.pallas_call(
        _gcn_stack_kernel,
        out_shape=jax.ShapeDtypeStruct((Ntot, d_out), jnp.float32),
    )(adj, x, w1, b1, w2, b2, w3, b3)


def pma_gcn(seed, xcat, adj, scat, mask_add, p, *, B, Nmax, num_heads):
    Sq, d = seed.shape
    return pl.pallas_call(
        functools.partial(_pma_gcn_kernel, B=B, Sq=Sq, Nmax=Nmax,
                          num_heads=num_heads, dim_V=d),
        out_shape=jax.ShapeDtypeStruct((B * Sq, d), jnp.float32),
    )(seed, xcat, adj, scat, mask_add,
      p["Wq"], p["bq"], p["Wkv"], p["bkv"], p["Wo"], p["bo"])


def mab_linear(qin, kin, p, *, B, Sq, Nk, num_heads, dim_V):
    return pl.pallas_call(
        functools.partial(_mab_linear_kernel, B=B, Sq=Sq, Nk=Nk,
                          num_heads=num_heads, dim_V=dim_V),
        out_shape=jax.ShapeDtypeStruct((B * Sq, dim_V), jnp.float32),
    )(qin, kin, p["Wq"], p["bq"], p["Wkv"], p["bkv"], p["Wo"], p["bo"])


def classifier(x, p1, p2, p3):
    return pl.pallas_call(
        _classifier_kernel,
        out_shape=jax.ShapeDtypeStruct((x.shape[0], p3[0].shape[1]), jnp.float32),
    )(x, p1[0], p1[1], p2[0], p2[1], p3[0], p3[1])


# ----------------------------- model glue ------------------------------------

def _init_linear(key, fan_in, fan_out):
    k1, k2 = jax.random.split(key)
    scale = 1.0 / math.sqrt(fan_in)
    w = jax.random.uniform(k1, (fan_in, fan_out), jnp.float32, -scale, scale)
    b = jax.random.uniform(k2, (1, fan_out), jnp.float32, -scale, scale)
    return w, b


def _mab_params(keys, d_in, d_v):
    """fc_q: d_in->d_v, fc_k/fc_v: d_in->d_v (stored fused as Wkv), fc_o: d_v->d_v."""
    wq, bq = _init_linear(next(keys), d_in, d_v)
    wk, bk = _init_linear(next(keys), d_in, d_v)
    wv, bv = _init_linear(next(keys), d_in, d_v)
    wo, bo = _init_linear(next(keys), d_v, d_v)
    return {
        "Wq": wq, "bq": bq,
        "Wkv": jnp.concatenate([wk, wv], axis=1),
        "bkv": jnp.concatenate([bk, bv], axis=1),
        "Wo": wo, "bo": bo,
    }


def make_dense_maps(batch_np, B, Nmax):
    """to_dense_batch (sorted batch vector) as a one-hot scatter matrix + additive mask."""
    n = batch_np.shape[0]
    counts = np.bincount(batch_np, minlength=B)
    starts = np.concatenate([[0], np.cumsum(counts)[:-1]])
    pos = np.arange(n) - starts[batch_np]
    scat = np.zeros((B * Nmax, n), np.float32)
    scat[batch_np * Nmax + pos, np.arange(n)] = 1.0
    mask = np.zeros((B, Nmax), np.float32)
    mask[batch_np, pos] = 1.0
    mask_add = (1.0 - mask) * -1e9
    return jnp.asarray(scat), jnp.asarray(mask_add)


if __name__ == "__main__":
    # ----- args -----
    num_features, nhid, num_classes = 16, 32, 5
    num_convs, num_heads = 3, 4
    pooling_ratio, avg_num_nodes = 0.5, 8

    # ----- synthetic graph batch (2 graphs: 6 and 8 nodes) -----
    B = 2
    nodes_per_graph = [6, 8]
    Ntot = sum(nodes_per_graph)
    Nmax = max(nodes_per_graph)
    batch_np = np.concatenate(
        [np.full(n, g, dtype=np.int32) for g, n in enumerate(nodes_per_graph)])

    A = np.zeros((Ntot, Ntot), np.float32)
    off = 0
    for n in nodes_per_graph:
        for i in range(n):                      # ring
            j = (i + 1) % n
            A[off + i, off + j] = 1.0
            A[off + j, off + i] = 1.0
        A[off, off + n // 2] = 1.0              # one chord
        A[off + n // 2, off] = 1.0
        off += n
    A_hat = A + np.eye(Ntot, dtype=np.float32)  # GCN: add self loops
    dinv = 1.0 / np.sqrt(A_hat.sum(1))
    adj_norm = jnp.asarray(dinv[:, None] * A_hat * dinv[None, :])

    key = jax.random.PRNGKey(0)
    key, kx = jax.random.split(key)
    x = jax.random.normal(kx, (Ntot, num_features), jnp.float32)

    # ----- deterministic parameters -----
    keys = iter(jax.random.split(key, 64))
    conv_params = []
    din = num_features
    for _ in range(num_convs):
        conv_params.append(_init_linear(next(keys), din, nhid))
        din = nhid
    d_cat = nhid * num_convs                     # 96
    seeds0 = math.ceil(pooling_ratio * avg_num_nodes)  # 4

    pma0 = _mab_params(keys, d_cat, d_cat)       # GMPool_G: 4 seeds, GCN K/V
    S0 = jax.random.normal(next(keys), (seeds0, d_cat), jnp.float32) / math.sqrt(d_cat)
    sab1 = _mab_params(keys, d_cat, nhid)        # SelfAtt 96 -> 32
    pma2 = _mab_params(keys, nhid, nhid)         # GMPool_I: 1 seed
    S2 = jax.random.normal(next(keys), (1, nhid), jnp.float32) / math.sqrt(nhid)
    # (pools[-1] = nn.Linear(32, nhid) exists in __init__ but is unused in forward.)
    cls1 = _init_linear(next(keys), nhid, nhid)
    cls2 = _init_linear(next(keys), nhid, nhid // 2)
    cls3 = _init_linear(next(keys), nhid // 2, num_classes)

    scat, mask_add = make_dense_maps(batch_np, B, Nmax)

    # ----- forward (5 fused pallas_calls) -----
    # 1) 3x GCNConv + relu, concat features                              [Ntot, 96]
    xcat = gcn_stack(adj_norm, x, conv_params)

    # 2) GMPool_G: PMA(96, H, 4) with GCN-projected K/V, masked attention [B*4, 96]
    h1 = pma_gcn(S0, xcat, adj_norm, scat, mask_add, pma0,
                 B=B, Nmax=Nmax, num_heads=num_heads)

    # 3) SelfAtt: SAB(96 -> 32), mask is None after the first pool        [B*4, 32]
    h2 = mab_linear(h1, h1, sab1, B=B, Sq=seeds0, Nk=seeds0,
                    num_heads=num_heads, dim_V=nhid)

    # 4) GMPool_I: PMA(32, H, 1)                                          [B*1, 32]
    q2 = jnp.tile(S2, (B, 1))
    h3 = mab_linear(q2, h2, pma2, B=B, Sq=1, Nk=seeds0,
                    num_heads=num_heads, dim_V=nhid)

    # 5) squeeze(1) + classifier (dropout = identity at eval) + log_softmax [B, 5]
    logp = classifier(h3, cls1, cls2, cls3)

    logp = jax.block_until_ready(logp)
    assert logp.shape == (B, num_classes)
    assert bool(jnp.all(jnp.isfinite(logp)))
    print("KERNEL_OK")
</pallas_src>

<mosaic_0001>
module attributes {stable_mosaic.version = 11 : i64} {
  func.func @_gcn_stack_kernel(%arg0: memref<14x14xf32, #tpu.memory_space<vmem>>, %arg1: memref<14x16xf32, #tpu.memory_space<vmem>>, %arg2: memref<16x32xf32, #tpu.memory_space<vmem>>, %arg3: memref<1x32xf32, #tpu.memory_space<vmem>>, %arg4: memref<32x32xf32, #tpu.memory_space<vmem>>, %arg5: memref<1x32xf32, #tpu.memory_space<vmem>>, %arg6: memref<32x32xf32, #tpu.memory_space<vmem>>, %arg7: memref<1x32xf32, #tpu.memory_space<vmem>>, %arg8: memref<14x96xf32, #tpu.memory_space<vmem>>) attributes {dimension_semantics = [], scalar_prefetch = 0 : i64, scratch_operands = 0 : i64, tpu.core_type = #tpu.core_type<tc>} {
    %c0 = arith.constant 0 : index
    %c0_0 = arith.constant 0 : index
    %0 = vector.load %arg0[%c0, %c0_0] : memref<14x14xf32, #tpu.memory_space<vmem>>, vector<14x14xf32>
    %c0_1 = arith.constant 0 : index
    %c0_2 = arith.constant 0 : index
    %1 = vector.load %arg1[%c0_1, %c0_2] : memref<14x16xf32, #tpu.memory_space<vmem>>, vector<14x16xf32>
    %c0_3 = arith.constant 0 : index
    %c0_4 = arith.constant 0 : index
    %2 = vector.load %arg2[%c0_3, %c0_4] : memref<16x32xf32, #tpu.memory_space<vmem>>, vector<16x32xf32>
    %cst = arith.constant dense<0.000000e+00> : vector<14x32xf32>
    %3 = tpu.matmul %1, %2, %cst {dimension_numbers = #tpu.dot_dimension_numbers<[1], [0], [0], [1], [0, 0, 1, 1], [], []>} : vector<14x16xf32>, vector<16x32xf32>, vector<14x32xf32> -> vector<14x32xf32>
    %cst_5 = arith.constant dense<0.000000e+00> : vector<14x32xf32>
    %4 = tpu.matmul %0, %3, %cst_5 {dimension_numbers = #tpu.dot_dimension_numbers<[1], [0], [0], [1], [0, 0, 1, 1], [], []>} : vector<14x14xf32>, vector<14x32xf32>, vector<14x32xf32> -> vector<14x32xf32>
    %c0_6 = arith.constant 0 : index
    %c0_7 = arith.constant 0 : index
    %5 = vector.load %arg3[%c0_6, %c0_7] : memref<1x32xf32, #tpu.memory_space<vmem>>, vector<1x32xf32>
    %6 = vector.broadcast %5 : vector<1x32xf32> to vector<14x32xf32>
    %7 = arith.addf %4, %6 : vector<14x32xf32>
    %cst_8 = arith.constant 0.000000e+00 : f32
    %8 = vector.broadcast %cst_8 : f32 to vector<14x32xf32>
    %9 = arith.maximumf %7, %8 : vector<14x32xf32>
    %c0_9 = arith.constant 0 : index
    %c0_10 = arith.constant 0 : index
    %10 = vector.load %arg4[%c0_9, %c0_10] : memref<32x32xf32, #tpu.memory_space<vmem>>, vector<32x32xf32>
    %cst_11 = arith.constant dense<0.000000e+00> : vector<14x32xf32>
    %11 = tpu.matmul %9, %10, %cst_11 {dimension_numbers = #tpu.dot_dimension_numbers<[1], [0], [0], [1], [0, 0, 1, 1], [], []>} : vector<14x32xf32>, vector<32x32xf32>, vector<14x32xf32> -> vector<14x32xf32>
    %cst_12 = arith.constant dense<0.000000e+00> : vector<14x32xf32>
    %12 = tpu.matmul %0, %11, %cst_12 {dimension_numbers = #tpu.dot_dimension_numbers<[1], [0], [0], [1], [0, 0, 1, 1], [], []>} : vector<14x14xf32>, vector<14x32xf32>, vector<14x32xf32> -> vector<14x32xf32>
    %c0_13 = arith.constant 0 : index
    %c0_14 = arith.constant 0 : index
    %13 = vector.load %arg5[%c0_13, %c0_14] : memref<1x32xf32, #tpu.memory_space<vmem>>, vector<1x32xf32>
    %14 = vector.broadcast %13 : vector<1x32xf32> to vector<14x32xf32>
    %15 = arith.addf %12, %14 : vector<14x32xf32>
    %cst_15 = arith.constant 0.000000e+00 : f32
    %16 = vector.broadcast %cst_15 : f32 to vector<14x32xf32>
    %17 = arith.maximumf %15, %16 : vector<14x32xf32>
    %c0_16 = arith.constant 0 : index
    %c0_17 = arith.constant 0 : index
    %18 = vector.load %arg6[%c0_16, %c0_17] : memref<32x32xf32, #tpu.memory_space<vmem>>, vector<32x32xf32>
    %cst_18 = arith.constant dense<0.000000e+00> : vector<14x32xf32>
    %19 = tpu.matmul %17, %18, %cst_18 {dimension_numbers = #tpu.dot_dimension_numbers<[1], [0], [0], [1], [0, 0, 1, 1], [], []>} : vector<14x32xf32>, vector<32x32xf32>, vector<14x32xf32> -> vector<14x32xf32>
    %cst_19 = arith.constant dense<0.000000e+00> : vector<14x32xf32>
    %20 = tpu.matmul %0, %19, %cst_19 {dimension_numbers = #tpu.dot_dimension_numbers<[1], [0], [0], [1], [0, 0, 1, 1], [], []>} : vector<14x14xf32>, vector<14x32xf32>, vector<14x32xf32> -> vector<14x32xf32>
    %c0_20 = arith.constant 0 : index
    %c0_21 = arith.constant 0 : index
    %21 = vector.load %arg7[%c0_20, %c0_21] : memref<1x32xf32, #tpu.memory_space<vmem>>, vector<1x32xf32>
    %22 = vector.broadcast %21 : vector<1x32xf32> to vector<14x32xf32>
    %23 = arith.addf %20, %22 : vector<14x32xf32>
    %cst_22 = arith.constant 0.000000e+00 : f32
    %24 = vector.broadcast %cst_22 : f32 to vector<14x32xf32>
    %25 = arith.maximumf %23, %24 : vector<14x32xf32>
    %26 = tpu.concatenate %9, %17, %25 in 1 : vector<14x32xf32>, vector<14x32xf32>, vector<14x32xf32> -> vector<14x96xf32>
    %c0_23 = arith.constant 0 : index
    %c0_24 = arith.constant 0 : index
    %27 = vector.load %arg8[%c0_23, %c0_24] : memref<14x96xf32, #tpu.memory_space<vmem>>, vector<14x96xf32>
    tpu.vector_store %arg8[%c0_23, %c0_24], %26 {strides = array<i32>} : memref<14x96xf32, #tpu.memory_space<vmem>>, vector<14x96xf32>,
    return
  }
}

</mosaic_0001>

<bundles_post_ra>
// kernel: tpu_custom_call.1
= control target key start
LH: loop header
LB: loop body
LE: loop exit
PB: predicated region body
PF: predicated region fallthrough
CT: control target
= control target key end

     0   :  { %13 = vsyncpa [#allocation3], 0  ;;  %s1153_s0 = inlined_call_operand.hbm [shape: f32[14,14], index: 0, kind: input, shape index: {}]   ;;  %s1154_s1 = inlined_call_operand.hbm [shape: f32[14,16], index: 1, kind: input, shape index: {}]   ;;  %s1155_s2 = inlined_call_operand.hbm [shape: f32[16,32], index: 2, kind: input, shape index: {}]   ;;  %s1156_s3 = inlined_call_operand.vmem [shape: f32[1,32], index: 3, kind: input, shape index: {}]   ;;  %s1157_s4 = inlined_call_operand.hbm [shape: f32[32,32], index: 4, kind: input, shape index: {}]   ;;  %s1158_s5 = inlined_call_operand.vmem [shape: f32[1,32], index: 5, kind: input, shape index: {}]   ;;  %s1159_s6 = inlined_call_operand.hbm [shape: f32[32,32], index: 6, kind: input, shape index: {}]   ;;  %s1160_s7 = inlined_call_operand.vmem [shape: f32[1,32], index: 7, kind: input, shape index: {}]   ;;  %s1161_s8 = inlined_call_operand.hbm [shape: f32[14,96], index: 8, kind: output, shape index: {}]  }
   0x1   :  { %14 = vsyncpa [#allocation6], 0 }
   0x2   :  { %15 = vsyncpa [#allocation9], 0 }
   0x3   :  { %16 = vsyncpa [#allocation4], 0  ;;  %s953_s27 = smov [#allocation5]   ;;  %s954_s29 = smov [#allocation8]  }
   0x4   :  { %s34_s28 = sshll.u32 %s953_s27, 4  ;;  %s60_s30 = sshll.u32 %s954_s29, 4  ;;  %s35_s28 = int_to_ptr.vmem [resolvable:$true] %s34_s28  ;;  %s1009_s30 = int_to_ptr.vmem [resolvable:$true] %s60_s30 }
   0x5   :  { %s813_s11 = scalar_lea.hbm %s1154_s1, 256 }
   0x6   :  { %p814_p0 = scmp.ne.s32.totalorder %s1154_s1, %s813_s11  ;;  %p817_p1 = scmp.lt.u32.totalorder %s813_s11, %s1154_s1 }
   0x8   :  { %p819_p2 = pnand %p817_p1, %p814_p0 }
   0xa   :  { %822 = shalt.err (!%p819_p2)
}
   0xb   :  { %s823_s16 = scalar_lea.vmem %s35_s28, 256  ;;  %p828_p4 = scmp.lt.s32.totalorder %s35_s28, %s35_s28 }
   0xc   :  { %p824_p3 = scmp.ne.s32.totalorder %s35_s28, %s823_s16  ;;  %p829_p5 = scmp.lt.s32.totalorder %s823_s16, %s823_s16 }
   0xe   :  { %p830_p6 = por %p829_p5, %p828_p4 }
  0x10   :  { %p831_p7 = pnand %p830_p6, %p824_p3 }
  0x12   :  { %834 = shalt.err (!%p831_p7)
}
  0x13   :  { %s955_s17 = smov 128   ;;  %s956_s18 = smov 8  }
  0x14   :  { %40 = dma.hbm_to_vmem [thread:$0]  %s1154_s1, 256, %s35_s28, [#allocation6], %s955_s17, %s955_s17, %s956_s18  }
  0x15   :  { %s835_s23 = scalar_lea.hbm %s1157_s4, 512 }
  0x16   :  { %p836_p8 = scmp.ne.s32.totalorder %s1157_s4, %s835_s23  ;;  %p839_p9 = scmp.lt.u32.totalorder %s835_s23, %s1157_s4 }
  0x18   :  { %p841_p10 = pnand %p839_p9, %p836_p8 }
  0x1a   :  { %844 = shalt.err (!%p841_p10)
}
  0x1b   :  { %s845_s29 = scalar_lea.vmem %s1009_s30, 512  ;;  %p850_p12 = scmp.lt.s32.totalorder %s1009_s30, %s1009_s30 }
  0x1c   :  { %p846_p11 = scmp.ne.s32.totalorder %s1009_s30, %s845_s29  ;;  %p851_p13 = scmp.lt.s32.totalorder %s845_s29, %s845_s29 }
  0x1e   :  { %p852_p0 = por %p851_p13, %p850_p12 }
  0x20   :  { %p853_p1 = pnand %p852_p0, %p846_p11 }
  0x22   :  { %856 = shalt.err (!%p853_p1)
}
  0x23   :  { %66 = dma.hbm_to_vmem [thread:$0]  %s1157_s4, 512, %s1009_s30, [#allocation9], %s955_s17, %s955_s17, %s956_s18  }
  0x24   :  { %s957_s9 = smov [#allocation2]   ;;  %s958_s11 = smov [#allocation7]  }
  0x25   :  { %s22_s10 = sshll.u32 %s957_s9, 4  ;;  %s46_s12 = sshll.u32 %s958_s11, 4  ;;  %s23_s10 = int_to_ptr.vmem [resolvable:$true] %s22_s10  ;;  %s1046_s12 = int_to_ptr.vmem [resolvable:$true] %s46_s12 }
  0x26   :  { %s857_s15 = scalar_lea.hbm %s1153_s0, 256 }
  0x27   :  { %p858_p2 = scmp.ne.s32.totalorder %s1153_s0, %s857_s15  ;;  %p861_p3 = scmp.lt.u32.totalorder %s857_s15, %s1153_s0 }
  0x29   :  { %p863_p4 = pnand %p861_p3, %p858_p2 }
  0x2b   :  { %866 = shalt.err (!%p863_p4)
}
  0x2c   :  { %s867_s4 = scalar_lea.vmem %s23_s10, 256  ;;  %p872_p6 = scmp.lt.s32.totalorder %s23_s10, %s23_s10 }
  0x2d   :  { %p868_p5 = scmp.ne.s32.totalorder %s23_s10, %s867_s4  ;;  %p873_p7 = scmp.lt.s32.totalorder %s867_s4, %s867_s4 }
  0x2f   :  { %p874_p8 = por %p873_p7, %p872_p6 }
  0x31   :  { %p875_p9 = pnand %p874_p8, %p868_p5 }
  0x33   :  { %878 = shalt.err (!%p875_p9)
}
  0x34   :  { %28 = dma.hbm_to_vmem [thread:$0]  %s1153_s0, 256, %s23_s10, [#allocation3], %s955_s17, %s955_s17, %s956_s18  }
  0x35   :  { %s879_s25 = scalar_lea.hbm %s1155_s2, 256 }
  0x36   :  { %p880_p10 = scmp.ne.s32.totalorder %s1155_s2, %s879_s25  ;;  %p883_p11 = scmp.lt.u32.totalorder %s879_s25, %s1155_s2 }
  0x38   :  { %p885_p12 = pnand %p883_p11, %p880_p10 }
  0x3a   :  { %888 = shalt.err (!%p885_p12)
}
  0x3b   :  { %s889_s28 = scalar_lea.vmem %s1046_s12, 256  ;;  %p894_p0 = scmp.lt.s32.totalorder %s1046_s12, %s1046_s12 }
  0x3c   :  { %p890_p13 = scmp.ne.s32.totalorder %s1046_s12, %s889_s28  ;;  %p895_p1 = scmp.lt.s32.totalorder %s889_s28, %s889_s28 }
  0x3e   :  { %p896_p2 = por %p895_p1, %p894_p0 }
  0x40   :  { %p897_p3 = pnand %p896_p2, %p890_p13 }
  0x42   :  { %900 = shalt.err (!%p897_p3)
}
  0x43   :  { %52 = dma.hbm_to_vmem [thread:$0]  %s1155_s2, 256, %s1046_s12, [#allocation6], %s955_s17, %s955_s17, %s956_s18  }
  0x44   :  { %s959_s10 = smov [#allocation10]   ;;  %s901_s15 = scalar_lea.hbm %s1159_s6, 512 }
  0x45   :  { %s74_s11 = sshll.u32 %s959_s10, 4  ;;  %p902_p4 = scmp.ne.s32.totalorder %s1159_s6, %s901_s15  ;;  %s75_s11 = int_to_ptr.vmem [resolvable:$true] %s74_s11 }
  0x46   :  { %p905_p5 = scmp.lt.u32.totalorder %s901_s15, %s1159_s6 }
  0x48   :  { %p907_p6 = pnand %p905_p5, %p902_p4 }
  0x4a   :  { %910 = shalt.err (!%p907_p6)
}
  0x4b   :  { %s911_s4 = scalar_lea.vmem %s75_s11, 512  ;;  %p916_p8 = scmp.lt.s32.totalorder %s75_s11, %s75_s11 }
  0x4c   :  { %p912_p7 = scmp.ne.s32.totalorder %s75_s11, %s911_s4  ;;  %p917_p9 = scmp.lt.s32.totalorder %s911_s4, %s911_s4 }
  0x4e   :  { %p918_p10 = por %p917_p9, %p916_p8 }
  0x50   :  { %p919_p11 = pnand %p918_p10, %p912_p7 }
  0x52   :  { %922 = shalt.err (!%p919_p11)
}
  0x53   :  { %80 = dma.hbm_to_vmem [thread:$0]  %s1159_s6, 512, %s75_s11, [#allocation9], %s955_s17, %s955_s17, %s956_s18  }
  0x54   :  { %945 = dma.done.wait [#allocation3], 256  }
  0x55   :  { %946 = vsyncadd [#allocation3], 4294967040 }
  0x56   :  { %947 = dma.done.wait [#allocation6], 512  }
  0x57   :  { %948 = vsyncadd [#allocation6], 4294966784 }
  0x58   :  { %949 = dma.done.wait [#allocation9], 1024  }
  0x59   :  { %950 = vsyncadd [#allocation9], 4294966272  ;;  %vm104_vm0 = vcmask 130048   ;;  %v102_v0 = vld [vmem:[#allocation7] sm:$0xff]  ;;  %v103_v1 = vld [vmem:[#allocation7 + $0x8] sm:$0xff]  ;;  %vm193_vm1 = vcmask 113664  }
  0x5a   :  { %v100_v2 = vld [vmem:[#allocation5] sm:$0xff]  ;;  %v764_v3 = vpack.c.bf16 %v103_v1, %v102_v0  ;;  %v101_v4 = vld [vmem:[#allocation5 + $0x8] sm:$0x3f]  ;;  %v98_v5 = vld [vmem:[#allocation2] sm:$0xff]  ;;  %vm200_vm2 = vcmask 1045504   ;;  %vm960_vm3 = vmmov 1  }
  0x5b   :  { %718 = vmatprep.mubr.msk.f32.mxu0 %vm104_vm0, %v100_v2  ;;  %725 = vmatprep.mubr.msk.f32.mxu1 %vm193_vm1, %v98_v5  ;;  %v281_v6 = vld [vmem:[#allocation8] sm:$0xff]  ;;  %v282_v7 = vld [vmem:[#allocation8 + $0x8] sm:$0xff]  ;;  %vm1099_vm4 = vmpackc.low %vm200_vm2, %vm960_vm3  ;;  %vm285_vm5 = vcmask 261120   ;;  %s961_s23 = smov 32   ;;  %s962_s25 = smov 64   ;;  %vm642_vm6 = vcmask 523264  }
  0x5c   :  { %765 = vmatprep.subr.bf16.mxu0 %v764_v3  ;;  %v774_v8 = vpack.c.bf16 %v282_v7, %v281_v6  ;;  %v99_v13 = vld [vmem:[#allocation2 + $0x8] sm:$0x3f]  ;;  %v283_v14 = vld [vmem:[#allocation8 + $0x10] sm:$0xff]  ;;  %v454_v24 = vld [vmem:[#allocation10] sm:$0xff]  ;;  %vm645_vm7 = vcmask 785408   ;;  %s963_s26 = smov [#allocation11]  }
  0x5d   :  { %767 = vmatpush3.bf16.msra.mxu0 %v764_v3  ;;  %v284_v15 = vld [vmem:[#allocation8 + $0x18] sm:$0xff]  ;;  %v670_v17 = vld [vmem:[%s1156_s3] ss:$0 sm:$0xff]  ;;  %v455_v25 = vld [vmem:[#allocation10 + $0x8] sm:$0xff]  ;;  %s654_s27 = sshll.u32 %s963_s26, 4  ;;  %vm647_vm8 = vcmask 783360   ;;  %s655_s27 = int_to_ptr.vmem [resolvable:$true] %s654_s27 }
  0x5e   :  { %775 = vmatprep.subr.bf16.mxu0 %v774_v8  ;;  %v778_v16 = vpack.c.bf16 %v284_v15, %v283_v14  ;;  %v788_v29 = vpack.c.bf16 %v455_v25, %v454_v24  ;;  %v456_v30 = vld [vmem:[#allocation10 + $0x10] sm:$0xff]  ;;  %v457_v31 = vld [vmem:[#allocation10 + $0x18] sm:$0xff]  ;;  %p928_p13 = scmp.lt.s32.totalorder %s655_s27, %s655_s27 }
  0x5f   :  { %v792_v32 = vpack.c.bf16 %v457_v31, %v456_v30  ;;  %v676_v33 = vld [vmem:[%s1158_s5] ss:$0 sm:$0xff] }
  0x60   :  { %719 = vmatmul.mubr.msk.f32.vlgmr.msra.gmra.mrb[0].mxu0 %vm104_vm0, %v101_v4  ;;  %v682_v43 = vld [vmem:[%s1160_s7] ss:$0 sm:$0xff]  ;;  %s923_s7 = scalar_lea.vmem %s655_s27, 256 }
  0x61   :  { %777 = vmatpush3.bf16.msra.mxu0 %v774_v8  ;;  %p924_p12 = scmp.ne.s32.totalorder %s655_s27, %s923_s7  ;;  %p929_p0 = scmp.lt.s32.totalorder %s923_s7, %s923_s7 }
  0x62   :  { %779 = vmatprep.subr.bf16.mxu0 %v778_v16 }
  0x63   :  { %p930_p1 = por %p929_p0, %p928_p13 }
  0x65   :  { %781 = vmatpush3.bf16.msra.mxu0 %v778_v16  ;;  %p931_p2 = pnand %p930_p1, %p924_p12 }
 0x133   :  { %v720_v9 = vpop.f32.mrb[0].mxu0 }
 0x134   :  { %v177_v10 = vpop.f32.mrb[1].mxu0 }
 0x135   :  { %v768_v12 = vpack.c.bf16 %v720_v9, %v177_v10 }
 0x137   :  { %770 = vmatprep.subr.msk.bf16.mxu1 %vm1099_vm4, %v768_v12 }
 0x138   :  { %773 = vmatpush3.bf16.msk.msra.mxu1 %vm1099_vm4, %v768_v12 }
 0x13b   :  { %726 = vmatmul.mubr.msk.f32.vlgmr.msra.gmra.mrb[0].mxu1 %vm193_vm1, %v99_v13 }
 0x13c   :  { %743 = vmatprep.mubr.msk.f32.mxu1 %vm193_vm1, %v98_v5 }
 0x20e   :  { %v727_v18 = vpop.f32.mrb[0].mxu1 }
 0x20f   :  { %v1112_v19 = vadd.f32 %v727_v18, %v670_v17  ;;  %v270_v20 = vpop.f32.mrb[1].mxu1 }
 0x210   :  { %v271_v21 = vadd.f32 %v670_v17, %v270_v20 }
 0x211   :  { %v280_v23 = vmax.f32 %v1112_v19, 0.0 }
 0x212   :  { %v279_v22 = vmax.f32 %v271_v21, 0.0 }
 0x214   :  { %736 = vmatprep.mubr.msk.f32.mxu0 %vm285_vm5, %v279_v22 }
 0x215   :  { %737 = vmatmul.mubr.msk.f32.vlgmr.msra.gmra.mrb[2].mxu0 %vm285_vm5, %v280_v23 }
 0x216   :  { %761 = vmatprep.mubr.msk.f32.mxu0 %vm193_vm1, %v98_v5 }
 0x2e8   :  { %v738_v26 = vpop.f32.mrb[2].mxu0 }
 0x2e9   :  { %v358_v27 = vpop.f32.mrb[3].mxu0 }
 0x2ea   :  { %v782_v28 = vpack.c.bf16 %v738_v26, %v358_v27 }
 0x2ec   :  { %784 = vmatprep.subr.msk.bf16.mxu1 %vm1099_vm4, %v782_v28 }
 0x2ed   :  { %787 = vmatpush3.bf16.msk.msra.mxu1 %vm1099_vm4, %v782_v28 }
 0x2ee   :  { %789 = vmatprep.subr.bf16.mxu1 %v788_v29 }
 0x2f0   :  { %744 = vmatmul.mubr.msk.f32.vlgmr.msra.gmra.mrb[2].mxu1 %vm193_vm1, %v99_v13 }
 0x2f1   :  { %791 = vmatpush3.bf16.msra.mxu1 %v788_v29 }
 0x2f2   :  { %793 = vmatprep.subr.bf16.mxu1 %v792_v32 }
 0x2f5   :  { %795 = vmatpush3.bf16.msra.mxu1 %v792_v32 }
 0x3c3   :  { %v745_v34 = vpop.f32.mrb[2].mxu1 }
 0x3c4   :  { %v449_v35 = vadd.f32 %v745_v34, %v676_v33  ;;  %v443_v36 = vpop.f32.mrb[3].mxu1 }
 0x3c5   :  { %v444_v37 = vadd.f32 %v676_v33, %v443_v36 }
 0x3c6   :  { %v453_v39 = vmax.f32 %v449_v35, 0.0 }
 0x3c7   :  { %v452_v38 = vmax.f32 %v444_v37, 0.0 }
 0x3c9   :  { %626 = vrot.lane.b32.xlu0 %v452_v38, %s961_s23  ;;  %754 = vmatprep.mubr.msk.f32.mxu1 %vm285_vm5, %v452_v38 }
 0x3ca   :  { %755 = vmatmul.mubr.msk.f32.vlgmr.msra.gmra.mrb[4].mxu1 %vm285_vm5, %v453_v39 }
 0x3cd   :  { %628 = vrot.lane.b32.xlu0 %v453_v39, %s961_s23 }
 0x43b   :  { %v627_v50 = vpop.permute.xlu0 %626 }
 0x43c   :  { %v640_v51 = vsel %vm285_vm5, %v279_v22, %v627_v50 }
 0x43f   :  { %v629_v53 = vpop.permute.xlu0 %628 }
 0x440   :  { %v641_v55 = vsel %vm285_vm5, %v280_v23, %v629_v53 }
 0x49d   :  { %v756_v40 = vpop.f32.mrb[4].mxu1 }
 0x49e   :  { %v530_v41 = vpop.f32.mrb[5].mxu1 }
 0x49f   :  { %v796_v42 = vpack.c.bf16 %v756_v40, %v530_v41 }
 0x4a1   :  { %798 = vmatprep.subr.msk.bf16.mxu0 %vm1099_vm4, %v796_v42 }
 0x4a2   :  { %801 = vmatpush3.bf16.msk.msra.mxu0 %vm1099_vm4, %v796_v42 }
 0x4a5   :  { %762 = vmatmul.mubr.msk.f32.vlgmr.msra.gmra.mrb[4].mxu0 %vm193_vm1, %v99_v13 }
 0x578   :  { %v763_v44 = vpop.f32.mrb[4].mxu0 }
 0x579   :  { %v615_v45 = vpop.f32.mrb[5].mxu0  ;;  %v621_v47 = vadd.f32 %v763_v44, %v682_v43 }
 0x57a   :  { %v616_v46 = vadd.f32 %v682_v43, %v615_v45 }
 0x57b   :  { %v625_v49 = vmax.f32 %v621_v47, 0.0 }
 0x57c   :  { %v624_v48 = vmax.f32 %v616_v46, 0.0 }
 0x57e   :  { %634 = vrot.lane.b32.xlu1 %v624_v48, %s962_s25 }
 0x582   :  { %636 = vrot.lane.b32.xlu1 %v625_v49, %s962_s25 }
 0x5f0   :  { %v635_v52 = vpop.permute.xlu1 %634 }
 0x5f1   :  { %v643_v54 = vsel %vm642_vm6, %v640_v51, %v635_v52 }
 0x5f2   :  { %646 = vst.msk [vmem:[#allocation11] sm:$0xff] %vm645_vm7, %v643_v54 }
 0x5f4   :  { %v637_v56 = vpop.permute.xlu1 %636 }
 0x5f5   :  { %v644_v57 = vsel %vm642_vm6, %v641_v55, %v637_v56 }
 0x5f6   :  { %648 = vst.msk [vmem:[#allocation11 + $0x8] sm:$0x3f] %vm647_vm8, %v644_v57 }
 0x5f7   :  { %934 = shalt.err (!%p931_p2)
}
 0x5f8   :  { %s935_s28 = scalar_lea.hbm %s1161_s8, 256 }
 0x5f9   :  { %p936_p3 = scmp.ne.s32.totalorder %s1161_s8, %s935_s28  ;;  %p939_p4 = scmp.lt.u32.totalorder %s935_s28, %s1161_s8 }
 0x5fb   :  { %p941_p5 = pnand %p939_p4, %p936_p3 }
 0x5fd   :  { %944 = shalt.err (!%p941_p5)
}
 0x5fe   :  { %660 = dma.vmem_to_hbm [thread:$0]  %s655_s27, 256, %s1161_s8, [#allocation4], %s955_s17, %s955_s17, %s956_s18  }
 0x5ff   :  { %951 = dma.done.wait [#allocation4], 256  }
 0x600   :  { %952 = vsyncadd [#allocation4], 4294967040 }
 0x601   :  { %664 = vsyncpa [#allocation3], 1 }
 0x602   :  { %665 = vsyncpa [#allocation6], 1 }
 0x603   :  { %666 = vsyncpa [#allocation9], 1 }
 0x604   :  { %667 = vsyncpa [#allocation4], 1 }

</bundles_post_ra>
